<compile_context>
chip_gen: v5e
topology: v5e:2x2
jax: 0.10.0
libtpu: 0.0.40
codegen_flags: <defaults>
</compile_context>

<pallas_src>
import math

import jax
import jax.numpy as jnp
from jax.experimental import pallas as pl
from jax.experimental.pallas import tpu as pltpu


def local_att_kernel(x_ref, logit_ref, w_ref, bias_ref, o_ref):
    # x_ref:     (tm, R*in_dim)
    # logit_ref: (tm, R*out_dim)
    # w_ref:     (R*in_dim, R*out_dim)  block-diagonal, BN scale pre-folded
    # bias_ref:  (1, R*out_dim)         folded BN bias, tiled R times
    # o_ref:     (tm, R*out_dim)
    y = jnp.dot(x_ref[...], w_ref[...], preferred_element_type=jnp.float32)
    y = jnp.maximum(y + bias_ref[...], 0.0)          # folded-BN bias + ReLU
    gate = jax.nn.sigmoid(logit_ref[...])            # exp/recip on the EUP slot
    o_ref[...] = (y * gate).astype(o_ref.dtype)


def _pack_factor(in_dim, out_dim, max_r=32):
    """Smallest R such that R*in_dim and R*out_dim are multiples of the 128-lane width."""
    r = math.lcm(128 // math.gcd(128, in_dim), 128 // math.gcd(128, out_dim))
    return r if r <= max_r else 1


def local_att(x, logit, w, scale, bias, *, tile_rows=1024):
    """out[n, :] = relu((x[n] @ w) * scale + bias) * sigmoid(logit[n])."""
    N, in_dim = x.shape
    out_dim = w.shape[1]
    assert logit.shape == (N, out_dim)

    # Fold the eval-mode BatchNorm scale into the weight; only the bias survives.
    w_folded = (w * scale[None, :]).astype(jnp.float32)

    # Lane-dense packing: R consecutive points per packed row.
    R = _pack_factor(in_dim, out_dim)
    in_p, out_p = R * in_dim, R * out_dim

    # Block-diagonal weight (R copies of the folded weight) and R-tiled bias.
    w_big = jnp.kron(jnp.eye(R, dtype=jnp.float32), w_folded) if R > 1 else w_folded
    bias_big = jnp.tile(bias.reshape(1, out_dim).astype(jnp.float32), (1, R))

    # Pad N so it packs into whole tile_rows-sized packed-row tiles (no divisibility assert).
    M = -(-N // R)                              # packed rows needed
    tm = min(tile_rows, -(-M // 8) * 8)         # tile rows: multiple of 8, capped at need
    M_pad = -(-M // tm) * tm
    N_pad = M_pad * R
    if N_pad != N:
        x = jnp.pad(x, ((0, N_pad - N), (0, 0)))
        logit = jnp.pad(logit, ((0, N_pad - N), (0, 0)))

    x_p = x.reshape(M_pad, in_p)          # row m = points [m*R, (m+1)*R) concatenated
    logit_p = logit.reshape(M_pad, out_p)

    grid = (M_pad // tm,)
    cost = pl.CostEstimate(
        flops=2 * N_pad * in_dim * out_dim,
        transcendentals=N_pad * out_dim,
        bytes_accessed=4 * (N_pad * (in_dim + 2 * out_dim) + in_p * out_p + out_p),
    )

    out_packed = pl.pallas_call(
        local_att_kernel,
        out_shape=jax.ShapeDtypeStruct((M_pad, out_p), x.dtype),
        grid_spec=pl.GridSpec(
            grid=grid,
            in_specs=[
                pl.BlockSpec((tm, in_p), lambda i: (i, 0)),
                pl.BlockSpec((tm, out_p), lambda i: (i, 0)),
                pl.BlockSpec((in_p, out_p), lambda i: (0, 0)),
                pl.BlockSpec((1, out_p), lambda i: (0, 0)),
            ],
            out_specs=pl.BlockSpec((tm, out_p), lambda i: (i, 0)),
        ),
        compiler_params=pltpu.CompilerParams(
            dimension_semantics=("parallel",),
        ),
        cost_estimate=cost,
    )(x_p, logit_p, w_big, bias_big)

    return out_packed.reshape(N_pad, out_dim)[:N]


if __name__ == "__main__":
    key = jax.random.PRNGKey(0)
    N, in_dim, out_dim = 256, 16, 32

    k_x, k_l, k_w, k_g, k_b, k_m, k_v = jax.random.split(key, 7)
    x = jax.random.normal(k_x, (N, in_dim), dtype=jnp.float32)
    logit = jax.random.normal(k_l, (N, out_dim), dtype=jnp.float32)

    # Deterministic synthetic parameters (Linear weight [in_dim, out_dim], BN params).
    w = jax.random.normal(k_w, (in_dim, out_dim), dtype=jnp.float32) * (1.0 / jnp.sqrt(in_dim))
    gamma = 1.0 + 0.1 * jax.random.normal(k_g, (out_dim,), dtype=jnp.float32)
    beta = 0.1 * jax.random.normal(k_b, (out_dim,), dtype=jnp.float32)
    running_mean = 0.1 * jax.random.normal(k_m, (out_dim,), dtype=jnp.float32)
    running_var = jnp.abs(1.0 + 0.1 * jax.random.normal(k_v, (out_dim,), dtype=jnp.float32))
    eps = 1e-5

    scale = gamma / jnp.sqrt(running_var + eps)
    bias = beta - running_mean * scale

    out = local_att(x, logit, w, scale, bias)
    out = jax.block_until_ready(out)

    # Pure-JAX reference check.
    y_ref = x @ w
    y_ref = y_ref * scale[None, :] + bias[None, :]
    y_ref = jnp.maximum(y_ref, 0.0)
    ref = y_ref * jax.nn.sigmoid(logit)
    assert out.shape == ref.shape
    assert jnp.allclose(out, ref, atol=1e-4, rtol=1e-4), "mismatch vs reference"

    print("KERNEL_OK")
</pallas_src>

<mosaic_0001>
module attributes {stable_mosaic.version = 11 : i64} {
  func.func @local_att_kernel(%arg0: i32, %arg1: memref<32x128xf32, #tpu.memory_space<vmem>>, %arg2: memref<32x256xf32, #tpu.memory_space<vmem>>, %arg3: memref<128x256xf32, #tpu.memory_space<vmem>>, %arg4: memref<1x256xf32, #tpu.memory_space<vmem>>, %arg5: memref<32x256xf32, #tpu.memory_space<vmem>>) attributes {dimension_semantics = [#tpu.dimension_semantics<parallel>], iteration_bounds = array<i64: 1>, scalar_prefetch = 0 : i64, scratch_operands = 0 : i64, tpu.core_type = #tpu.core_type<tc>, window_params = [{transform_indices = @transform_0, window_bounds = array<i64: 32, 128>}, {transform_indices = @transform_1, window_bounds = array<i64: 32, 256>}, {pipeline_mode = #tpu.pipeline_mode<synchronous>, transform_indices = @transform_2, window_bounds = array<i64: 128, 256>}, {pipeline_mode = #tpu.pipeline_mode<synchronous>, transform_indices = @transform_3, window_bounds = array<i64: 1, 256>}, {transform_indices = @transform_4, window_bounds = array<i64: 32, 256>}]} {
    %c0 = arith.constant 0 : index
    %c0_0 = arith.constant 0 : index
    %0 = vector.load %arg1[%c0, %c0_0] : memref<32x128xf32, #tpu.memory_space<vmem>>, vector<32x128xf32>
    %c0_1 = arith.constant 0 : index
    %c0_2 = arith.constant 0 : index
    %1 = vector.load %arg3[%c0_1, %c0_2] : memref<128x256xf32, #tpu.memory_space<vmem>>, vector<128x256xf32>
    %cst = arith.constant dense<0.000000e+00> : vector<32x256xf32>
    %2 = tpu.matmul %0, %1, %cst {dimension_numbers = #tpu.dot_dimension_numbers<[1], [0], [0], [1], [0, 0, 1, 1], [], []>} : vector<32x128xf32>, vector<128x256xf32>, vector<32x256xf32> -> vector<32x256xf32>
    %c0_3 = arith.constant 0 : index
    %c0_4 = arith.constant 0 : index
    %3 = vector.load %arg4[%c0_3, %c0_4] : memref<1x256xf32, #tpu.memory_space<vmem>>, vector<1x256xf32>
    %4 = vector.broadcast %3 : vector<1x256xf32> to vector<32x256xf32>
    %5 = arith.addf %2, %4 : vector<32x256xf32>
    %cst_5 = arith.constant 0.000000e+00 : f32
    %6 = vector.broadcast %cst_5 : f32 to vector<32x256xf32>
    %7 = arith.maximumf %5, %6 : vector<32x256xf32>
    %c0_6 = arith.constant 0 : index
    %c0_7 = arith.constant 0 : index
    %8 = vector.load %arg2[%c0_6, %c0_7] : memref<32x256xf32, #tpu.memory_space<vmem>>, vector<32x256xf32>
    %9 = arith.negf %8 : vector<32x256xf32>
    %10 = math.exp %9 : vector<32x256xf32>
    %cst_8 = arith.constant 1.000000e+00 : f32
    %11 = vector.broadcast %cst_8 : f32 to vector<32x256xf32>
    %12 = arith.addf %11, %10 : vector<32x256xf32>
    %13 = arith.divf %11, %12 : vector<32x256xf32>
    %14 = arith.mulf %7, %13 : vector<32x256xf32>
    %c0_9 = arith.constant 0 : index
    %c0_10 = arith.constant 0 : index
    %15 = vector.load %arg5[%c0_9, %c0_10] : memref<32x256xf32, #tpu.memory_space<vmem>>, vector<32x256xf32>
    tpu.vector_store %arg5[%c0_9, %c0_10], %14 {strides = array<i32>} : memref<32x256xf32, #tpu.memory_space<vmem>>, vector<32x256xf32>,
    return
  }
  func.func @transform_0(%arg0: i32) -> (i32, i32) {
    %c0_i32 = arith.constant 0 : i32
    %c0_i32_0 = arith.constant 0 : i32
    return %arg0, %c0_i32 : i32, i32
  }
  func.func @transform_1(%arg0: i32) -> (i32, i32) {
    %c0_i32 = arith.constant 0 : i32
    %c0_i32_0 = arith.constant 0 : i32
    return %arg0, %c0_i32 : i32, i32
  }
  func.func @transform_2(%arg0: i32) -> (i32, i32) {
    %c0_i32 = arith.constant 0 : i32
    %c0_i32_0 = arith.constant 0 : i32
    %c0_i32_1 = arith.constant 0 : i32
    return %c0_i32, %c0_i32_0 : i32, i32
  }
  func.func @transform_3(%arg0: i32) -> (i32, i32) {
    %c0_i32 = arith.constant 0 : i32
    %c0_i32_0 = arith.constant 0 : i32
    %c0_i32_1 = arith.constant 0 : i32
    return %c0_i32, %c0_i32_0 : i32, i32
  }
  func.func @transform_4(%arg0: i32) -> (i32, i32) {
    %c0_i32 = arith.constant 0 : i32
    %c0_i32_0 = arith.constant 0 : i32
    return %arg0, %c0_i32 : i32, i32
  }
}

</mosaic_0001>

<bundles_post_ra>
// kernel: tpu_custom_call.1
= control target key start
LH: loop header
LB: loop body
LE: loop exit
PB: predicated region body
PF: predicated region fallthrough
CT: control target
= control target key end

     0   :  { %9 = vsyncpa [#allocation3], 0  ;;  %s832_s0 = inlined_call_operand.hbm [shape: f32[32,128], index: 0, kind: input, shape index: {}]   ;;  %s833_s1 = inlined_call_operand.hbm [shape: f32[32,256], index: 1, kind: input, shape index: {}]   ;;  %s834_s2 = inlined_call_operand.hbm [shape: f32[128,256], index: 2, kind: input, shape index: {}]   ;;  %s835_s3 = inlined_call_operand.vmem [shape: f32[1,256], index: 3, kind: input, shape index: {}]   ;;  %s836_s4 = inlined_call_operand.hbm [shape: f32[32,256], index: 4, kind: output, shape index: {}]  }
   0x1   :  { %10 = vsyncpa [#allocation6], 0  ;;  %s29_s17 = sshll.u32 %s833_s1, 4  ;;  %s30_s17 = int_to_ptr.hbm [resolvable:$true] %s29_s17 }
   0x2   :  { %11 = vsyncpa [#allocation4], 0  ;;  %s551_s18 = smov [#allocation5]   ;;  %s16_s22 = sshll.u32 %s832_s0, 4  ;;  %s17_s22 = int_to_ptr.hbm [resolvable:$true] %s16_s22 }
   0x3   :  { %s31_s19 = sshll.u32 %s551_s18, 4  ;;  %s552_s23 = smov 256   ;;  %s32_s19 = int_to_ptr.vmem [resolvable:$true] %s31_s19 }
   0x4   :  { %s553_s24 = smov 16   ;;  %s554_s25 = smov [#allocation2]  }
   0x5   :  { %37 = dma.hbm_to_vmem [thread:$0]  %s30_s17, 1024, %s32_s19, [#allocation6], %s552_s23, %s552_s23, %s553_s24  }
   0x6   :  { %s18_s26 = sshll.u32 %s554_s25, 4  ;;  %s555_s1 = smov 128   ;;  %s19_s26 = int_to_ptr.vmem [resolvable:$true] %s18_s26 }
   0x7   :  { %s556_s27 = smov 8   ;;  %s42_s30 = sshll.u32 %s834_s2, 4  ;;  %s43_s30 = int_to_ptr.hbm [resolvable:$true] %s42_s30 }
   0x8   :  { %24 = dma.hbm_to_vmem [thread:$0]  %s17_s22, 512, %s19_s26, [#allocation3], %s555_s1, %s555_s1, %s556_s27  }
   0x9   :  { %s557_s5 = smov [#allocation7]  }
   0xa   :  { %s44_s0 = sshll.u32 %s557_s5, 4  ;;  %s45_s0 = int_to_ptr.vmem [resolvable:$true] %s44_s0 }
   0xb   :  { %50 = dma.hbm_to_vmem [thread:$0]  %s43_s30, 4096, %s45_s0, [#allocation6], %s552_s23, %s552_s23, %s553_s24  }
   0xc   :  { %545 = dma.done.wait [#allocation3], 512  }
   0xd   :  { %546 = vsyncadd [#allocation3], 4294966784 }
   0xe   :  { %547 = dma.done.wait [#allocation6], 5120  }
   0xf   :  { %548 = vsyncadd [#allocation6], 4294962176  ;;  %v99_v0 = vld [vmem:[#allocation7 + $0xf0] sm:$0xff]  ;;  %v100_v1 = vld [vmem:[#allocation7 + $0xf8] sm:$0xff]  ;;  %s355_s10 = sshll.u32 %s836_s4, 4  ;;  %s356_s10 = int_to_ptr.hbm [resolvable:$true] %s355_s10 }
  0x10   :  { %v97_v2 = vld [vmem:[#allocation7 + $0xe0] sm:$0xff]  ;;  %377 = vmatpush.msra.mxu2 %v99_v0  ;;  %393 = vmatpush.msra.mxu3 %v100_v1  ;;  %v98_v3 = vld [vmem:[#allocation7 + $0xe8] sm:$0xff]  ;;  %v95_v4 = vld [vmem:[#allocation7 + $0xd0] sm:$0xff] }
  0x11   :  { %v96_v5 = vld [vmem:[#allocation7 + $0xd8] sm:$0xff]  ;;  %107 = vmatpush.msra.mxu0 %v99_v0  ;;  %136 = vmatpush.msra.mxu1 %v100_v1  ;;  %v93_v6 = vld [vmem:[#allocation7 + $0xc0] sm:$0xff]  ;;  %v94_v7 = vld [vmem:[#allocation7 + $0xc8] sm:$0xff] }
  0x12   :  { %378 = vmatpush.msra.mxu2 %v97_v2  ;;  %394 = vmatpush.msra.mxu3 %v98_v3  ;;  %v91_v8 = vld [vmem:[#allocation7 + $0xb0] sm:$0xff]  ;;  %v92_v9 = vld [vmem:[#allocation7 + $0xb8] sm:$0xff]  ;;  %v89_v10 = vld [vmem:[#allocation7 + $0xa0] sm:$0xff] }
  0x13   :  { %108 = vmatpush.msra.mxu0 %v97_v2  ;;  %137 = vmatpush.msra.mxu1 %v98_v3  ;;  %v90_v11 = vld [vmem:[#allocation7 + $0xa8] sm:$0xff]  ;;  %v87_v12 = vld [vmem:[#allocation7 + $0x90] sm:$0xff]  ;;  %v88_v13 = vld [vmem:[#allocation7 + $0x98] sm:$0xff] }
  0x14   :  { %379 = vmatpush.msra.mxu2 %v95_v4  ;;  %395 = vmatpush.msra.mxu3 %v96_v5  ;;  %v85_v14 = vld [vmem:[#allocation7 + $0x80] sm:$0xff]  ;;  %v86_v15 = vld [vmem:[#allocation7 + $0x88] sm:$0xff]  ;;  %v83_v16 = vld [vmem:[#allocation7 + $0x70] sm:$0xff] }
  0x15   :  { %109 = vmatpush.msra.mxu0 %v95_v4  ;;  %138 = vmatpush.msra.mxu1 %v96_v5  ;;  %v84_v17 = vld [vmem:[#allocation7 + $0x78] sm:$0xff]  ;;  %v81_v18 = vld [vmem:[#allocation7 + $0x60] sm:$0xff]  ;;  %v82_v19 = vld [vmem:[#allocation7 + $0x68] sm:$0xff] }
  0x16   :  { %380 = vmatpush.msra.mxu2 %v93_v6  ;;  %396 = vmatpush.msra.mxu3 %v94_v7  ;;  %v79_v20 = vld [vmem:[#allocation7 + $0x50] sm:$0xff]  ;;  %v80_v21 = vld [vmem:[#allocation7 + $0x58] sm:$0xff]  ;;  %v77_v22 = vld [vmem:[#allocation7 + $0x40] sm:$0xff] }
  0x17   :  { %110 = vmatpush.msra.mxu0 %v93_v6  ;;  %139 = vmatpush.msra.mxu1 %v94_v7  ;;  %v78_v23 = vld [vmem:[#allocation7 + $0x48] sm:$0xff]  ;;  %v75_v24 = vld [vmem:[#allocation7 + $0x30] sm:$0xff]  ;;  %v76_v25 = vld [vmem:[#allocation7 + $0x38] sm:$0xff] }
  0x18   :  { %381 = vmatpush.msra.mxu2 %v91_v8  ;;  %397 = vmatpush.msra.mxu3 %v92_v9  ;;  %v73_v26 = vld [vmem:[#allocation7 + $0x20] sm:$0xff]  ;;  %v74_v27 = vld [vmem:[#allocation7 + $0x28] sm:$0xff]  ;;  %v71_v28 = vld [vmem:[#allocation7 + $0x10] sm:$0xff] }
  0x19   :  { %111 = vmatpush.msra.mxu0 %v91_v8  ;;  %140 = vmatpush.msra.mxu1 %v92_v9  ;;  %v72_v29 = vld [vmem:[#allocation7 + $0x18] sm:$0xff]  ;;  %v69_v30 = vld [vmem:[#allocation7] sm:$0xff]  ;;  %v70_v31 = vld [vmem:[#allocation7 + $0x8] sm:$0xff] }
  0x1a   :  { %382 = vmatpush.msra.mxu2 %v89_v10  ;;  %398 = vmatpush.msra.mxu3 %v90_v11  ;;  %v67_v32 = vld [vmem:[#allocation2 + $0x10] sm:$0xff]  ;;  %v65_v33 = vld [vmem:[#allocation2] sm:$0xff]  ;;  %v68_v34 = vld [vmem:[#allocation2 + $0x18] sm:$0xff] }
  0x1b   :  { %112 = vmatpush.msra.mxu0 %v89_v10  ;;  %141 = vmatpush.msra.mxu1 %v90_v11  ;;  %v66_v35 = vld [vmem:[#allocation2 + $0x8] sm:$0xff]  ;;  %v173_v36 = vld [vmem:[#allocation5] sm:$0xff]  ;;  %v175_v50 = vld [vmem:[#allocation5 + $0x10] sm:$0xff] }
  0x1c   :  { %383 = vmatpush.msra.mxu2 %v87_v12  ;;  %399 = vmatpush.msra.mxu3 %v88_v13  ;;  %v177_v37 = vld [vmem:[#allocation5 + $0x20] sm:$0xff]  ;;  %v174_v38 = vld [vmem:[#allocation5 + $0x8] sm:$0xff]  ;;  %v369_v39 = vmul.f32 -1.442695, %v173_v36  ;;  %v179_v52 = vld [vmem:[#allocation5 + $0x30] sm:$0xff] }
  0x1d   :  { %113 = vmatpush.msra.mxu0 %v87_v12  ;;  %142 = vmatpush.msra.mxu1 %v88_v13  ;;  %v373_v40 = vmul.f32 -1.442695, %v177_v37  ;;  %v178_v41 = vld [vmem:[#allocation5 + $0x28] sm:$0xff]  ;;  %v370_v42 = vmul.f32 -1.442695, %v174_v38  ;;  %v176_v54 = vld [vmem:[#allocation5 + $0x18] sm:$0xff] }
  0x1e   :  { %384 = vmatpush.msra.mxu2 %v85_v14  ;;  %400 = vmatpush.msra.mxu3 %v86_v15  ;;  %v374_v43 = vmul.f32 -1.442695, %v178_v41  ;;  %417 = vpow2.f32 %v369_v39  ;;  %v371_v55 = vmul.f32 -1.442695, %v175_v50  ;;  %v180_v56 = vld [vmem:[#allocation5 + $0x38] sm:$0xff] }
  0x1f   :  { %114 = vmatpush.msra.mxu0 %v85_v14  ;;  %143 = vmatpush.msra.mxu1 %v86_v15  ;;  %419 = vpow2.f32 %v373_v40  ;;  %v375_v57 = vmul.f32 -1.442695, %v179_v52  ;;  %v372_v58 = vmul.f32 -1.442695, %v176_v54  ;;  %v376_v59 = vmul.f32 -1.442695, %v180_v56 }
  0x20   :  { %385 = vmatpush.msra.mxu2 %v83_v16  ;;  %401 = vmatpush.msra.mxu3 %v84_v17  ;;  %421 = vpow2.f32 %v370_v42 }
  0x21   :  { %115 = vmatpush.msra.mxu0 %v83_v16  ;;  %144 = vmatpush.msra.mxu1 %v84_v17  ;;  %423 = vpow2.f32 %v374_v43 }
  0x22   :  { %386 = vmatpush.msra.mxu2 %v81_v18  ;;  %402 = vmatpush.msra.mxu3 %v82_v19 }
  0x23   :  { %116 = vmatpush.msra.mxu0 %v81_v18  ;;  %145 = vmatpush.msra.mxu1 %v82_v19 }
  0x24   :  { %387 = vmatpush.msra.mxu2 %v79_v20  ;;  %403 = vmatpush.msra.mxu3 %v80_v21  ;;  %v418_v44 = vpop.eup %417 }
  0x25   :  { %117 = vmatpush.msra.mxu0 %v79_v20  ;;  %146 = vmatpush.msra.mxu1 %v80_v21  ;;  %v420_v45 = vpop.eup %419  ;;  %v599_v48 = vadd.f32 1.0, %v418_v44 }
  0x26   :  { %388 = vmatpush.msra.mxu2 %v77_v22  ;;  %404 = vmatpush.msra.mxu3 %v78_v23  ;;  %v422_v46 = vpop.eup %421  ;;  %v601_v49 = vadd.f32 1.0, %v420_v45 }
  0x27   :  { %118 = vmatpush.msra.mxu0 %v77_v22  ;;  %147 = vmatpush.msra.mxu1 %v78_v23  ;;  %v424_v47 = vpop.eup %423  ;;  %v603_v51 = vadd.f32 1.0, %v422_v46  ;;  %425 = vrcp.f32 %v599_v48  ;;  %vm218_vm0 = vweird.f32 %v599_v48  ;;  %v222_v18 = vand.u32 2147483647, %v599_v48  ;;  %v101_v23 = vld [vmem:[%s835_s3] sm:$0x3]  ;;  %s558_s3 = smov [#allocation8]  }
  0x28   :  { %389 = vmatpush.msra.mxu2 %v75_v24  ;;  %405 = vmatpush.msra.mxu3 %v76_v25  ;;  %v605_v53 = vadd.f32 1.0, %v424_v47  ;;  %427 = vrcp.f32 %v601_v49  ;;  %v224_v20 = vand.u32 2147483648, %v599_v48  ;;  %vm278_vm2 = vweird.f32 %v601_v49  ;;  %s353_s7 = sshll.u32 %s558_s3, 4  ;;  %s354_s7 = int_to_ptr.vmem [resolvable:$true] %s353_s7 }
  0x29   :  { %119 = vmatpush.msra.mxu0 %v75_v24  ;;  %148 = vmatpush.msra.mxu1 %v76_v25  ;;  %429 = vrcp.f32 %v603_v51  ;;  %v284_v21 = vand.u32 2147483648, %v601_v49  ;;  %vm233_vm4 = vweird.f32 %v603_v51  ;;  %v683_v36 = vperm.slane %v101_v23, 0 }
  0x2a   :  { %390 = vmatpush.msra.mxu2 %v73_v26  ;;  %406 = vmatpush.msra.mxu3 %v74_v27  ;;  %431 = vrcp.f32 %v605_v53  ;;  %vm293_vm8 = vweird.f32 %v605_v53  ;;  %vm685_vm10 = vcmp.eq.f32.partialorder %v222_v18, 8.507059e+37  ;;  %v225_v38 = vor.u32 1.1754944e-38, %v224_v20 }
  0x2b   :  { %120 = vmatpush.msra.mxu0 %v73_v26  ;;  %149 = vmatpush.msra.mxu1 %v74_v27  ;;  %433 = vpow2.f32 %v371_v55  ;;  %v299_v40 = vand.u32 2147483648, %v605_v53  ;;  %v285_v42 = vor.u32 1.1754944e-38, %v284_v21  ;;  %v297_v44 = vand.u32 2147483647, %v605_v53 }
  0x2c   :  { %391 = vmatpush.msra.mxu2 %v71_v28  ;;  %407 = vmatpush.msra.mxu3 %v72_v29  ;;  %435 = vpow2.f32 %v375_v57 }
  0x2d   :  { %121 = vmatpush.msra.mxu0 %v71_v28  ;;  %150 = vmatpush.msra.mxu1 %v72_v29  ;;  %v611_v60 = vpop.eup %425  ;;  %437 = vpow2.f32 %v372_v58  ;;  %v282_v28 = vand.u32 2147483647, %v601_v49  ;;  %v237_v29 = vand.u32 2147483647, %v603_v51  ;;  %v300_v55 = vor.u32 1.1754944e-38, %v299_v40 }
  0x2e   :  { %392 = vmatpush.msra.mxu2 %v69_v30  ;;  %408 = vmatpush.msra.mxu3 %v70_v31  ;;  %v613_v61 = vpop.eup %427  ;;  %439 = vpow2.f32 %v376_v59  ;;  %v214_v1 = vmul.f32 %v611_v60, %v599_v48  ;;  %vm219_vm1 = vweird.f32 %v611_v60  ;;  %v730_v58 = vperm.slane %v101_v23, 1 }
  0x2f   :  { %129 = vmatmul.f32.vlgmr.msra.gmra.mxu2 %v67_v32  ;;  %158 = vmatmul.f32.vlgmr.msra.gmra.mxu3 %v67_v32  ;;  %v615_v62 = vpop.eup %429  ;;  %v274_v3 = vmul.f32 %v613_v61, %v601_v49  ;;  %vm279_vm3 = vweird.f32 %v613_v61  ;;  %vm660_vm6 = vmor %vm218_vm0, %vm219_vm1  ;;  %vm710_vm12 = vcmp.eq.f32.partialorder %v282_v28, 8.507059e+37  ;;  %vm238_vm14 = vcmp.eq.f32.partialorder %v237_v29, 8.507059e+37 }
  0x30   :  { %122 = vmatpush.msra.mxu0 %v69_v30  ;;  %151 = vmatpush.msra.mxu1 %v70_v31  ;;  %v617_v63 = vpop.eup %431  ;;  %v229_v5 = vmul.f32 %v615_v62, %v603_v51  ;;  %v215_v7 = vsub.f32 1.0, %v214_v1  ;;  %vm234_vm5 = vweird.f32 %v615_v62  ;;  %v239_v30 = vand.u32 2147483648, %v603_v51  ;;  %vm672_vm7 = vmor %vm278_vm2, %vm279_vm3 }
  0x31   :  { %123 = vmatmul.f32.vlgmr.msra.gmra.mxu0 %v65_v33  ;;  %152 = vmatmul.f32.vlgmr.msra.gmra.mxu1 %v65_v33  ;;  %v434_v0 = vpop.eup %433  ;;  %v289_v8 = vmul.f32 %v617_v63, %v605_v53  ;;  %v275_v11 = vsub.f32 1.0, %v274_v3  ;;  %vm294_vm9 = vweird.f32 %v617_v63  ;;  %vm693_vm11 = vmor %vm233_vm4, %vm234_vm5  ;;  %vm298_vm15 = vcmp.eq.f32.partialorder %v297_v44, 8.507059e+37 }
  0x32   :  { %v436_v2 = vpop.eup %435  ;;  %v627_v9 = vadd.f32 1.0, %v434_v0  ;;  %v230_v13 = vsub.f32 1.0, %v229_v5  ;;  %v216_v15 = vmul.f32 %v611_v60, %v215_v7  ;;  %v240_v49 = vor.u32 1.1754944e-38, %v239_v30  ;;  %vm718_vm13 = vmor %vm293_vm8, %vm294_vm9 }
  0x33   :  { %v438_v4 = vpop.eup %437  ;;  %v629_v10 = vadd.f32 1.0, %v436_v2  ;;  %v290_v16 = vsub.f32 1.0, %v289_v8  ;;  %v276_v17 = vmul.f32 %v613_v61, %v275_v11 }
  0x34   :  { %v440_v6 = vpop.eup %439  ;;  %v631_v12 = vadd.f32 1.0, %v438_v4  ;;  %441 = vrcp.f32 %v627_v9  ;;  %v231_v19 = vmul.f32 %v615_v62, %v230_v13  ;;  %v217_v24 = vadd.f32 %v611_v60, %v216_v15 }
  0x35   :  { %v634_v14 = vadd.f32 1.0, %v440_v6  ;;  %443 = vrcp.f32 %v629_v10  ;;  %v291_v25 = vmul.f32 %v617_v63, %v290_v16  ;;  %v277_v27 = vadd.f32 %v613_v61, %v276_v17 }
  0x36   :  { %445 = vrcp.f32 %v631_v12  ;;  %v232_v33 = vadd.f32 %v615_v62, %v231_v19  ;;  %v221_v46 = vsel %vm660_vm6, %v611_v60, %v217_v24  ;;  %v252_v56 = vand.u32 2147483647, %v627_v9 }
  0x37   :  { %132 = vmatmul.f32.gmra.mxu2 %v68_v34  ;;  %161 = vmatmul.f32.gmra.mxu3 %v68_v34  ;;  %447 = vrcp.f32 %v634_v14  ;;  %v292_v43 = vadd.f32 %v617_v63, %v291_v25  ;;  %v281_v47 = vsel %vm672_vm7, %v613_v61, %v277_v27  ;;  %v254_v60 = vand.u32 2147483648, %v627_v9 }
  0x38   :  { %v236_v51 = vsel %vm693_vm11, %v615_v62, %v232_v33  ;;  %v226_v61 = vsel %vm685_vm10, %v225_v38, %v221_v46  ;;  %v286_v62 = vsel %vm710_vm12, %v285_v42, %v281_v47  ;;  %vm248_vm0 = vweird.f32 %v627_v9 }
  0x39   :  { %126 = vmatmul.f32.gmra.mxu0 %v66_v35  ;;  %155 = vmatmul.f32.gmra.mxu1 %v66_v35  ;;  %v296_v59 = vsel %vm718_vm13, %v617_v63, %v292_v43  ;;  %v241_v0 = vsel %vm238_vm14, %v240_v49, %v236_v51  ;;  %vm308_vm1 = vweird.f32 %v629_v10  ;;  %v267_v3 = vand.u32 2147483647, %v631_v12 }
  0x3a   :  { %v649_v22 = vpop.eup %441  ;;  %v301_v63 = vsel %vm298_vm15, %v300_v55, %v296_v59  ;;  %vm744_vm2 = vcmp.eq.f32.partialorder %v252_v56, 8.507059e+37  ;;  %v255_v11 = vor.u32 1.1754944e-38, %v254_v60  ;;  %v312_v13 = vand.u32 2147483647, %v629_v10 }
  0x3b   :  { %v668_v31 = vpop.eup %443  ;;  %v244_v34 = vmul.f32 %v649_v22, %v627_v9  ;;  %vm249_vm3 = vweird.f32 %v649_v22  ;;  %v314_v15 = vand.u32 2147483648, %v629_v10  ;;  %vm263_vm4 = vweird.f32 %v631_v12 }
  0x3c   :  { %v681_v35 = vpop.eup %445  ;;  %v304_v54 = vmul.f32 %v668_v31, %v629_v10  ;;  %vm758_vm6 = vcmp.eq.f32.partialorder %v267_v3, 8.507059e+37  ;;  %v269_v21 = vand.u32 2147483648, %v631_v12  ;;  %vm765_vm7 = vmor %vm248_vm0, %vm249_vm3  ;;  %vm309_vm8 = vweird.f32 %v668_v31 }
  0x3d   :  { %v698_v41 = vpop.eup %447  ;;  %v259_v45 = vmul.f32 %v681_v35, %v631_v12  ;;  %v245_v52 = vsub.f32 1.0, %v244_v34  ;;  %vm264_vm5 = vweird.f32 %v681_v35  ;;  %vm323_vm10 = vweird.f32 %v634_v14  ;;  %vm790_vm12 = vmor %vm308_vm1, %vm309_vm8 }
  0x3e   :  { %v319_v53 = vmul.f32 %v698_v41, %v634_v14  ;;  %v305_v2 = vsub.f32 1.0, %v304_v54  ;;  %vm772_vm9 = vmor %vm263_vm4, %vm264_vm5  ;;  %vm324_vm11 = vweird.f32 %v698_v41  ;;  %v327_v9 = vand.u32 2147483647, %v634_v14 }
  0x3f   :  { %v260_v57 = vsub.f32 1.0, %v259_v45  ;;  %v246_v1 = vmul.f32 %v649_v22, %v245_v52  ;;  %v270_v39 = vor.u32 1.1754944e-38, %v269_v21  ;;  %v329_v40 = vand.u32 2147483648, %v634_v14  ;;  %vm806_vm14 = vmor %vm323_vm10, %vm324_vm11 }
  0x40   :  { %v320_v6 = vsub.f32 1.0, %v319_v53  ;;  %v306_v19 = vmul.f32 %v668_v31, %v305_v2  ;;  %vm798_vm13 = vcmp.eq.f32.partialorder %v312_v13, 8.507059e+37  ;;  %v315_v48 = vor.u32 1.1754944e-38, %v314_v15 }
  0x41   :  { %v261_v5 = vmul.f32 %v681_v35, %v260_v57  ;;  %v247_v18 = vadd.f32 %v649_v22, %v246_v1  ;;  %vm328_vm15 = vcmp.eq.f32.partialorder %v327_v9, 8.507059e+37  ;;  %v330_v56 = vor.u32 1.1754944e-38, %v329_v40 }
  0x42   :  { %v321_v27 = vmul.f32 %v698_v41, %v320_v6  ;;  %v307_v38 = vadd.f32 %v668_v31, %v306_v19 }
  0x43   :  { %v262_v26 = vadd.f32 %v681_v35, %v261_v5  ;;  %v251_v37 = vsel %vm765_vm7, %v649_v22, %v247_v18 }
  0x44   :  { %v322_v45 = vadd.f32 %v698_v41, %v321_v27  ;;  %v256_v54 = vsel %vm744_vm2, %v255_v11, %v251_v37  ;;  %v311_v57 = vsel %vm790_vm12, %v668_v31, %v307_v38 }
  0x45   :  { %v266_v22 = vsel %vm772_vm9, %v681_v35, %v262_v26  ;;  %v316_v3 = vsel %vm798_vm13, %v315_v48, %v311_v57 }
  0x46   :  { %v271_v55 = vsel %vm758_vm6, %v270_v39, %v266_v22  ;;  %v326_v59 = vsel %vm806_vm14, %v698_v41, %v322_v45 }
  0xae   :  { %v124_v7 = vpop.f32.mrf.mxu0  ;;  %v153_v8 = vpop.f32.mrf.mxu1 }
  0xaf   :  { %v125_v16 = vadd.f32 %v124_v7, %v683_v36  ;;  %v154_v17 = vadd.f32 %v153_v8, %v730_v58 }
  0xb1   :  { %v165_v23 = vmax.f32 %v125_v16, 0.0  ;;  %v166_v24 = vmax.f32 %v154_v17, 0.0 }
  0xb2   :  { %v130_v28 = vpop.f32.mrf.mxu2  ;;  %v159_v29 = vpop.f32.mrf.mxu3 }
  0xb3   :  { %v333_v12 = vmul.f32 %v226_v61, %v165_v23  ;;  %v131_v32 = vadd.f32 %v130_v28, %v683_v36  ;;  %v334_v33 = vmul.f32 %v241_v0, %v166_v24  ;;  %v160_v34 = vadd.f32 %v159_v29, %v730_v58 }
  0xb5   :  { %341 = vst [vmem:[#allocation8] sm:$0xff] %v333_v12  ;;  %v169_v42 = vmax.f32 %v131_v32, 0.0  ;;  %v170_v43 = vmax.f32 %v160_v34, 0.0 }
  0xb6   :  { %342 = vst [vmem:[#allocation8 + $0x8] sm:$0xff] %v334_v33  ;;  %v127_v46 = vpop.f32.mrf.mxu0  ;;  %v156_v49 = vpop.f32.mrf.mxu1 }
  0xb7   :  { %v337_v50 = vmul.f32 %v286_v62, %v169_v42  ;;  %v338_v35 = vmul.f32 %v301_v63, %v170_v43  ;;  %v128_v51 = vadd.f32 %v127_v46, %v683_v36  ;;  %v157_v52 = vadd.f32 %v156_v49, %v730_v58 }
  0xb8   :  { %v331_v63 = vsel %vm328_vm15, %v330_v56, %v326_v59 }
  0xb9   :  { %345 = vst [vmem:[#allocation8 + $0x20] sm:$0xff] %v337_v50  ;;  %v167_v14 = vmax.f32 %v128_v51, 0.0  ;;  %v168_v53 = vmax.f32 %v157_v52, 0.0 }
  0xba   :  { %346 = vst [vmem:[#allocation8 + $0x28] sm:$0xff] %v338_v35  ;;  %v133_v60 = vpop.f32.mrf.mxu2  ;;  %v162_v61 = vpop.f32.mrf.mxu3 }
  0xbb   :  { %v335_v62 = vmul.f32 %v256_v54, %v167_v14  ;;  %v134_v0 = vadd.f32 %v133_v60, %v683_v36  ;;  %v336_v1 = vmul.f32 %v271_v55, %v168_v53  ;;  %v163_v2 = vadd.f32 %v162_v61, %v730_v58 }
  0xbd   :  { %343 = vst [vmem:[#allocation8 + $0x10] sm:$0xff] %v335_v62  ;;  %v171_v31 = vmax.f32 %v134_v0, 0.0  ;;  %v172_v4 = vmax.f32 %v163_v2, 0.0 }
  0xbe   :  { %344 = vst [vmem:[#allocation8 + $0x18] sm:$0xff] %v336_v1 }
  0xbf   :  { %v339_v41 = vmul.f32 %v316_v3, %v171_v31  ;;  %v340_v5 = vmul.f32 %v331_v63, %v172_v4 }
  0xc1   :  { %347 = vst [vmem:[#allocation8 + $0x30] sm:$0xff] %v339_v41 }
  0xc2   :  { %348 = vst [vmem:[#allocation8 + $0x38] sm:$0xff] %v340_v5 }
  0xc3   :  { %361 = dma.vmem_to_hbm [thread:$0]  %s354_s7, 1024, %s356_s10, [#allocation4], %s552_s23, %s552_s23, %s553_s24  }
  0xc4   :  { %549 = dma.done.wait [#allocation4], 1024  }
  0xc5   :  { %550 = vsyncadd [#allocation4], 4294966272 }
  0xc6   :  { %366 = vsyncpa [#allocation3], 1 }
  0xc7   :  { %367 = vsyncpa [#allocation6], 1 }
  0xc8   :  { %368 = vsyncpa [#allocation4], 1 }

</bundles_post_ra>
